<compile_context>
chip_gen: v7x
topology: tpu7x:2x2x1
jax: 0.10.0
libtpu: 0.0.40
codegen_flags: <defaults>
</compile_context>

<pallas_src>
import jax
import jax.numpy as jnp
from jax.experimental import pallas as pl
from jax.experimental.pallas import tpu as pltpu


def _chomp_copy_kernel(x_ref, o_ref):
    # Identical in/out blocks -> plain copy. The chomped region is never DMA'd
    # (except a few padded lanes of the final partial L tile, which are masked
    # out of the store by Pallas).
    o_ref[...] = x_ref[...]


def _round_up(x: int, m: int) -> int:
    return ((x + m - 1) // m) * m


def _cdiv(a: int, b: int) -> int:
    return (a + b - 1) // b


def _sublane_multiple(dtype) -> int:
    # Sub-32-bit dtypes pack along sublanes: 8 rows for 4-byte, 16 for 2-byte, 32 for 1-byte.
    itemsize = jnp.dtype(dtype).itemsize
    return max(8, 32 // max(1, itemsize))


def _choose_lane_tile(l_out: int) -> int:
    # Largest 128-multiple <= 1024 that minimizes padding of the final L block
    # (ties broken toward the larger tile -> fewer grid steps).
    cap = min(1024, _round_up(l_out, 128))
    best_lt, best_pad = 128, None
    for lt in range(128, cap + 1, 128):
        pad = _cdiv(l_out, lt) * lt - l_out
        if best_pad is None or pad < best_pad or (pad == best_pad and lt > best_lt):
            best_lt, best_pad = lt, pad
    return best_lt


def chomp1d(x: jax.Array, chomp_size: int, *, force_pallas: bool = False) -> jax.Array:
    """Equivalent of PyTorch Chomp1d.forward: x[:, :, :-chomp_size].contiguous()."""
    N, C, L = x.shape
    assert chomp_size >= 0, "chomp_size must be non-negative"

    # Match PyTorch slice semantics: :-0 and :-k with k >= L both give an empty dim.
    L_out = L - chomp_size
    if chomp_size == 0 or L_out <= 0:
        return x[:, :, :0]

    itemsize = jnp.dtype(x.dtype).itemsize
    out_bytes = N * C * L_out * itemsize

    # Fast path: short sequences force masked partial stores (<128 lanes), and
    # small copies are dominated by launch / per-grid-step overhead — let XLA slice.
    if L_out < 128 or (not force_pallas and out_bytes < (4 << 20)):
        return x[:, :, :L_out]

    # --- Collapse (N, C) into one row axis: payload no longer tied to C. ---
    R = N * C
    x2d = x.reshape(R, L)  # metadata-only (contiguous)

    # Lane tile: balanced 128-multiple.
    L_T = _choose_lane_tile(L_out)
    n_l = _cdiv(L_out, L_T)

    # Row tile: dtype-aligned, equal-sized chunks, per-block payload <= ~4 MiB so the
    # pipelined footprint (2 buffers x (in + out) = 4 blocks) stays ~16 MiB — safe on
    # v7x's 64 MiB physical VMEM and well under the explicit 32 MiB limit set below.
    sub = _sublane_multiple(x.dtype)
    target_block_bytes = 4 << 20
    max_rows = max(sub, (target_block_bytes // (L_T * itemsize)) // sub * sub)
    n_r = _cdiv(R, max_rows)
    # Keep enough independent grid steps for megacore sharding (aim >= 8 total).
    max_n_r = _cdiv(R, sub)
    while n_r * n_l < 8 and n_r < max_n_r:
        n_r += 1
    R_T = _round_up(_cdiv(R, n_r), sub)

    grid = (_cdiv(R, R_T), n_l)
    block = (R_T, L_T)
    index_map = lambda r, l: (r, l)  # shared verbatim by input and output

    # Note on padding: when a block extends past R or L_out (or even past L for the
    # final L tile), Pallas pads out-of-bounds reads and masks out-of-bounds writes,
    # so partial tiles are handled correctly.
    out2d = pl.pallas_call(
        _chomp_copy_kernel,
        out_shape=jax.ShapeDtypeStruct((R, L_out), x.dtype),
        grid_spec=pltpu.PrefetchScalarGridSpec(
            num_scalar_prefetch=0,
            grid=grid,
            in_specs=[pl.BlockSpec(block, index_map)],
            out_specs=pl.BlockSpec(block, index_map),
        ),
        compiler_params=pltpu.CompilerParams(
            dimension_semantics=("parallel", "parallel"),
            vmem_limit_bytes=32 << 20,  # > v5e's 16 MiB scoped default, <= v7x budget
        ),
    )(x2d)

    return out2d.reshape(N, C, L_out)  # metadata-only (contiguous)


if __name__ == "__main__":
    key = jax.random.PRNGKey(0)

    # 1) Small shape consistent with the module spec -> exercises the fast-path slice.
    x_small = jax.random.normal(key, (2, 4, 16), dtype=jnp.float32)
    y_small = jax.block_until_ready(chomp1d(x_small, 3))
    assert y_small.shape == (2, 4, 13), y_small.shape
    assert jnp.array_equal(y_small, x_small[:, :, :-3]), "fast-path mismatch"

    # 1b) PyTorch edge-case parity: chomp_size == 0 -> empty last dim.
    y_zero = jax.block_until_ready(chomp1d(x_small, 0))
    assert y_zero.shape == (2, 4, 0), y_zero.shape

    # 2) Lane-dense case through the Pallas kernel (L_out = 512, exact L tile,
    #    rows collapsed to N*C = 32).
    k1, k2 = jax.random.split(key)
    x1 = jax.random.normal(k1, (2, 16, 515), dtype=jnp.float32)
    y1 = jax.block_until_ready(chomp1d(x1, 3, force_pallas=True))
    assert y1.shape == (2, 16, 512), y1.shape
    assert jnp.array_equal(y1, x1[:, :, :-3]), "pallas f32 mismatch"

    # 3) Partial row/L tiles + sub-32-bit dtype (bf16) through the Pallas kernel
    #    (exercises balanced L_T selection and masked tail blocks).
    x2 = jax.random.normal(k2, (2, 12, 300), dtype=jnp.bfloat16)
    y2 = jax.block_until_ready(chomp1d(x2, 5, force_pallas=True))
    assert y2.shape == (2, 12, 295), y2.shape
    assert jnp.array_equal(y2, x2[:, :, :-5]), "pallas bf16 mismatch"

    print("KERNEL_OK")
</pallas_src>

<mosaic_0001>
module attributes {stable_mosaic.version = 11 : i64} {
  func.func @_chomp_copy_kernel(%arg0: i32, %arg1: i32, %arg2: memref<8x512xf32, #tpu.memory_space<vmem>>, %arg3: memref<8x512xf32, #tpu.memory_space<vmem>>) attributes {dimension_semantics = [#tpu.dimension_semantics<parallel>, #tpu.dimension_semantics<parallel>], iteration_bounds = array<i64: 4, 1>, scalar_prefetch = 0 : i64, scratch_operands = 0 : i64, tpu.core_type = #tpu.core_type<tc>, window_params = [{transform_indices = @transform_0, window_bounds = array<i64: 8, 512>}, {transform_indices = @transform_1, window_bounds = array<i64: 8, 512>}]} {
    %c0 = arith.constant 0 : index
    %c0_0 = arith.constant 0 : index
    %0 = vector.load %arg2[%c0, %c0_0] : memref<8x512xf32, #tpu.memory_space<vmem>>, vector<8x512xf32>
    %c0_1 = arith.constant 0 : index
    %c0_2 = arith.constant 0 : index
    %1 = vector.load %arg3[%c0_1, %c0_2] : memref<8x512xf32, #tpu.memory_space<vmem>>, vector<8x512xf32>
    tpu.vector_store %arg3[%c0_1, %c0_2], %0 {strides = array<i32>} : memref<8x512xf32, #tpu.memory_space<vmem>>, vector<8x512xf32>,
    return
  }
  func.func @transform_0(%arg0: i32, %arg1: i32) -> (i32, i32) {
    %c0_i32 = arith.constant 0 : i32
    return %arg0, %arg1 : i32, i32
  }
  func.func @transform_1(%arg0: i32, %arg1: i32) -> (i32, i32) {
    %c0_i32 = arith.constant 0 : i32
    return %arg0, %arg1 : i32, i32
  }
}

</mosaic_0001>

<bundles_post_ra>
// kernel: tpu_custom_call.1
= control target key start
LH: loop header
LB: loop body
LE: loop exit
PB: predicated region body
PF: predicated region fallthrough
CT: control target
= control target key end

     0   :  { %6 = vsyncpa [#allocation3], 0  ;;  %s644_s0 = inlined_call_operand.hbm [shape: f32[32,515], index: 0, kind: input, shape index: {}]   ;;  %s645_s1 = inlined_call_operand.hbm [shape: f32[32,512], index: 1, kind: output, shape index: {}]  }
   0x1   :  { %8 = vsyncpa [#allocation3 + $0x1], 0 }
   0x2   :  { %9 = vsyncpa [#allocation4], 0 }
   0x3   :  { %11 = vsyncpa [#allocation4 + $0x1], 0  ;;  %s476_s6 = smov 0   ;;  %s478_s7 = smov 0  }
   0x4   :  { %s480_s8 = smov 0   ;;  %s482_s9 = smov 0  }
   0x5   :  { %s484_s10 = smov 0   ;;  %s486_s11 = smov 0  }
   0x6 LB: > { %s272_s12 = sadd.s32 4294967295, %s462_s11   ;;  %s273_s13 = sadd.s32 4294967294, %s462_s11   ;;  %s462_s11 = sphi %s486_s11, %s17_s11   ;;  %s458_s10 = sphi %s484_s10, %s659_s10   ;;  %s454_s9 = sphi %s482_s9, %s658_s9   ;;  %s450_s8 = sphi %s480_s8, %s657_s8   ;;  %s446_s7 = sphi %s478_s7, %s656_s7   ;;  %s442_s6 = sphi %s476_s6, %s655_s6  }
   0x7   : > { %s29_s14 = sadd.s32 1, %s458_s10  ;;  %s38_s15 = sadd.s32 1, %s450_s8 }
   0x8   : > { %p31_p0 = scmp.ge.s32.totalorder %s29_s14, 4  ;;  %p45_p1 = scmp.ne.s32.totalorder %s450_s8, %s446_s7 }
   0x9   : > { %p46_p2 = scmp.eq.s32.totalorder %s462_s11, 0  ;;  %p51_p3 = scmp.ne.s32.totalorder %s446_s7, %s442_s6 }
   0xa   : > { %s661_s14 = smov (%p31_p0, %s29_s14), 0  ;;  %p52_p5 = scmp.eq.s32.totalorder %s272_s12, 0 }
   0xb   : > { %p517_p4 = por %p46_p2, %p45_p1  ;;  %s33_s17 = ssub.s32 %s458_s10, %s661_s14 }
   0xc   : > { %p77_p6 = scmp.eq.s32.totalorder %s272_s12, 3  ;;  %p36_p7 = scmp.eq.s32.totalorder %s33_s17, 0 }
   0xd   : > { %p523_p8 = por %p52_p5, %p51_p3  ;;  %p83_p10 = scmp.eq.s32.totalorder %s273_s13, 3 }
   0xe   : > { %p527_p9 = por %p77_p6, %p45_p1  ;;  %p300_p12 = scmp.lt.s32.totalorder %s462_s11, 4 }
   0xf   : > { %s532_s20 = scalar_select %p36_p7, %s450_s8, %s38_s15  }
  0x10   : > { %s649_s19 = scalar_select %p527_p9, 1, 0 }
  0x11   : > { %p534_p11 = por %p83_p10, %p51_p3  ;;  %s103_s22 = sand.u32 1, %s450_s8  }
  0x12   : > { %s276_s23 = sshll.u32 %s103_s22, 5  ;;  %s287_s24 = smul.u32 640, %s458_s10 }
  0x13   : > { %s650_s21 = scalar_select %p534_p11, 1, 0 }
  0x14   : > { %s107_s25 = scalar_lea.vmem [#allocation2], %s276_s23  ;;  %p543_p13 = pnand %p300_p12, %p517_p4 }
  0x15   : > { %s123_s26 = sshll.u32 %s107_s25, 4  ;;  %s550_s30 = scalar_lea.hbm %s644_s0, %s287_s24  ;;  %s552_s26 = int_to_ptr.vmem [resolvable:$true] %s123_s26 }
  0x16   : > { %s104_s2 = scalar_lea.sflag [#allocation3], %s103_s22  ;;  %s350_s3 = scalar_lea.hbm %s550_s30, 512 }
  0x17   : > { %p351_p1 = scmp.ne.s32.totalorder %s550_s30, %s350_s3  ;;  %p352_p2 = pneg %p543_p13 }
  0x18   : > { %s355_s12 = scalar_lea.hbm %s644_s0, 2560  ;;  %p356_p5 = scmp.lt.u32.totalorder %s550_s30, %s644_s0 }
  0x19   : > { %p353_p3 = pnand %p352_p2, %p351_p1  ;;  %p357_p6 = scmp.lt.u32.totalorder %s355_s12, %s350_s3 }
  0x1a   : > { %p359_p10 = scmp.lt.u32.totalorder %s350_s3, %s550_s30 }
  0x1b   : > { %p354_p4 = pneg %p353_p3  ;;  %p358_p7 = por %p357_p6, %p356_p5 }
  0x1d   : > { %p360_p12 = por %p359_p10, %p358_p7 }
  0x1f   : > { %p361_p0 = pnand %p360_p12, %p354_p4 }
  0x21   : > { %364 = shalt.err (!%p361_p0)
}
  0x22   : > { %s365_s16 = scalar_lea.vmem %s552_s26, 512  ;;  %s464_s17 = smov [#allocation2]  }
  0x23   : > { %p366_p1 = scmp.ne.s32.totalorder %s552_s26, %s365_s16  ;;  %s370_s22 = sshll.u32 %s464_s17, 4  ;;  %s371_s22 = int_to_ptr.vmem [resolvable:$false] %s370_s22 }
  0x24   : > { %s372_s23 = scalar_lea.vmem %s371_s22, 1024  ;;  %p373_p9 = scmp.lt.s32.totalorder %s552_s26, %s371_s22 }
  0x25   : > { %p368_p3 = pnand %p366_p1, %p352_p2  ;;  %p374_p5 = scmp.lt.s32.totalorder %s372_s23, %s365_s16 }
  0x27   : > { %p369_p11 = pneg %p368_p3  ;;  %p375_p6 = por %p374_p5, %p373_p9 }
  0x29   : > { %p376_p7 = pnand %p375_p6, %p369_p11 }
  0x2b   : > { %379 = shalt.err (!%p376_p7)
}
  0x2c   : > { %295 = dma.hbm_to_vmem [thread:$0]  (!%p543_p13), %s550_s30, 512, %s552_s26, %s104_s2  }
  0x2d   : > { %p128_p0 = scmp.lt.s32.totalorder %s462_s11, 5  ;;  %p652_p4 = scmp.ge.s32.totalorder %s462_s11, 1 }
  0x2f   : > { %p129_p2 = pnand %p652_p4, %p128_p0 }
  0x30   : > { %s584_s24 = sand.u32 (!%p129_p2), 1, %s446_s7  }
  0x31   : > { %132 = sbr.rel (%p129_p2) target bundleno = 83 (0x53), region = 24  ;;  %s279_s25 = sshll.u32 (!%p129_p2), %s584_s24, 5 }
  0x32   : > { %s135_s28 = scalar_lea.sflag (!%p129_p2), [#allocation3], %s584_s24  ;;  %s138_s29 = scalar_lea.vmem (!%p129_p2), [#allocation2], %s279_s25 }
  0x38   : > { %433 = dma.done.wait (%p523_p8), %s135_s28, 512  }
  0x39   : > { %435 = vsyncadd (%p523_p8), %s135_s28, 4294966784  ;;  %s156_s26 = scalar_lea.vmem [#allocation5], %s279_s25  ;;  %s286_s30 = sshll.u32 %s454_s9, 9  ;;  %v163_v0 = vld [vmem:[%s138_s29] sm:$0xff]  ;;  %v164_v1 = vld [vmem:[%s138_s29 + $0x8] sm:$0xff] }
  0x3a   : > { %s188_s27 = sshll.u32 %s156_s26, 4  ;;  %v165_v2 = vld [vmem:[%s138_s29 + $0x10] sm:$0xff]  ;;  %s598_s4 = scalar_lea.hbm %s645_s1, %s286_s30  ;;  %167 = vst [vmem:[%s156_s26] sm:$0xff] %v163_v0  ;;  %168 = vst [vmem:[%s156_s26 + $0x8] sm:$0xff] %v164_v1  ;;  %v166_v3 = vld [vmem:[%s138_s29 + $0x18] sm:$0xff]  ;;  %s593_s27 = int_to_ptr.vmem [resolvable:$true] %s188_s27 }
  0x3b   : > { %169 = vst [vmem:[%s156_s26 + $0x10] sm:$0xff] %v165_v2  ;;  %170 = vst [vmem:[%s156_s26 + $0x18] sm:$0xff] %v166_v3  ;;  %s172_s18 = scalar_lea.sflag [#allocation4], %s584_s24  ;;  %s380_s9 = scalar_lea.vmem %s593_s27, 512 }
  0x3c   : > { %p381_p8 = scmp.ne.s32.totalorder %s593_s27, %s380_s9  ;;  %p653_p9 = scmp.ne.s32.totalorder %s649_s19, 0 }
  0x3d   : > { %s465_s5 = smov [#allocation5]  }
  0x3e   : > { %p382_p11 = pnand %p381_p8, %p653_p9  ;;  %s384_s12 = sshll.u32 %s465_s5, 4  ;;  %s385_s12 = int_to_ptr.vmem [resolvable:$false] %s384_s12 }
  0x3f   : > { %s386_s13 = scalar_lea.vmem %s385_s12, 1024  ;;  %p387_p10 = scmp.lt.s32.totalorder %s593_s27, %s385_s12 }
  0x40   : > { %p383_p13 = pneg %p382_p11  ;;  %p388_p12 = scmp.lt.s32.totalorder %s386_s13, %s380_s9 }
  0x42   : > { %p389_p1 = por %p388_p12, %p387_p10 }
  0x44   : > { %p390_p3 = pnand %p389_p1, %p383_p13 }
  0x46   : > { %393 = shalt.err (!%p390_p3)
}
  0x47   : > { %s394_s15 = scalar_lea.hbm %s598_s4, 512  ;;  %s398_s22 = scalar_lea.hbm %s645_s1, 2048 }
  0x48   : > { %p395_p5 = scmp.ne.s32.totalorder %s598_s4, %s394_s15  ;;  %p399_p0 = scmp.lt.u32.totalorder %s598_s4, %s645_s1 }
  0x49   : > { %p400_p4 = scmp.lt.u32.totalorder %s398_s22, %s394_s15  ;;  %p402_p8 = scmp.lt.u32.totalorder %s394_s15, %s598_s4 }
  0x4a   : > { %p396_p6 = pnand %p395_p5, %p653_p9 }
  0x4b   : > { %p401_p2 = por %p400_p4, %p399_p0 }
  0x4c   : > { %p397_p7 = pneg %p396_p6 }
  0x4d   : > { %p403_p11 = por %p402_p8, %p401_p2 }
  0x4f   : > { %p404_p13 = pnand %p403_p11, %p397_p7 }
  0x51   : > { %407 = shalt.err (!%p404_p13)
}
  0x52   : > { %290 = dma.vmem_to_hbm [thread:$0]  (%p653_p9), %s593_s27, 512, %s598_s4, %s172_s18  }
  0x53 PF: > { %p301_p10 = scmp.ge.s32.totalorder %s462_s11, 2  ;;  %s200_s25 = sand.u32 1, %s442_s6  }
  0x54   : > { %p654_p12 = scmp.ne.s32.totalorder %s650_s21, 0  ;;  %s201_s28 = scalar_lea.sflag [#allocation4], %s200_s25 }
  0x56   : > { %p297_p1 = pnand %p301_p10, %p654_p12 }
  0x58   : > { %437 = dma.done.wait (!%p297_p1), %s201_s28, 512  }
  0x59   : > { %439 = vsyncadd (!%p297_p1), %s201_s28, 4294966784  ;;  %s17_s11 = sadd.s32 1, %s462_s11   ;;  %s655_s6 = smov %s446_s7 }
  0x5a   : > { %p14_p3 = scmp.ge.s32.totalorder %s17_s11, 6   ;;  %s656_s7 = smov %s450_s8 }
  0x5b   : > { %s657_s8 = smov %s532_s20  ;;  %s658_s9 = smov %s458_s10 }
  0x5c   : > { %s659_s10 = smov %s661_s14  ;;  %16 = sbr.rel (!%p14_p3) target bundleno = 6 (0x6), region = 69 }
  0x63   :  { %206 = vsyncpa [#allocation3], 1 }
  0x64   :  { %208 = vsyncpa [#allocation3 + $0x1], 1 }
  0x65   :  { %209 = vsyncpa [#allocation4], 1 }
  0x66   :  { %211 = vsyncpa [#allocation4 + $0x1], 1 }

</bundles_post_ra>
